<compile_context>
chip_gen: v5e
topology: v5e:2x2
jax: 0.10.0
libtpu: 0.0.40
codegen_flags: <defaults>
</compile_context>

<pallas_src>
import functools

import numpy as np
import jax
import jax.numpy as jnp
from jax import lax
from jax.experimental import pallas as pl
from jax.experimental.pallas import tpu as pltpu

_EPS = 1e-8            # torch nn.CosineSimilarity default eps
_EPS_SQ = _EPS * _EPS  # clamp on the product of squared norms

_NCORES = 2                              # leading "parallel" axis (megacore on v7x; harmless on 1-TC chips)
_VMEM_TILE_BUDGET = 14 * 1024 * 1024     # bytes used to derive the row tile
_VMEM_LIMIT = 40 * 1024 * 1024           # scoped VMEM limit handed to Mosaic


def _sim_loss_kernel(u_ref, s_ref, seg_ref, out_ref, *, r_valid, tile_r, precision):
    c = pl.program_id(0)                 # core-parallel axis
    i = pl.program_id(1)                 # sequential reduction axis
    bpc = pl.num_programs(1)             # row blocks per core

    @pl.when(i == 0)
    def _init():
        out_ref[...] = jnp.zeros_like(out_ref)

    u = u_ref[...]                       # (tile_r, L) in storage dtype (bf16 stays bf16)
    s = s_ref[...]
    seg = seg_ref[...]                   # (L, n_seg) block-diagonal ones, same dtype

    prod = u * s                         # VPU, native dtype
    uu = u * u
    ss = s * s

    # Segmented lane reductions on the MXU; accumulate in f32.
    dots = jnp.dot(prod, seg, preferred_element_type=jnp.float32, precision=precision)
    nu = jnp.dot(uu, seg, preferred_element_type=jnp.float32, precision=precision)
    ns = jnp.dot(ss, seg, preferred_element_type=jnp.float32, precision=precision)

    # dot / max(||u||*||s||, eps)  ==  dot * rsqrt(max(||u||^2*||s||^2, eps^2))
    sim = dots * lax.rsqrt(jnp.maximum(nu * ns, jnp.float32(_EPS_SQ)))   # (tile_r, n_seg)

    # Mask rows past the true packed-row count (replaces the wrapper-side jnp.pad).
    # NOTE: uses the *unclamped* block index so an extra clamped step on the
    # last core contributes exactly zero.
    n_seg = sim.shape[1]
    row_start = (c * bpc + i) * tile_r
    row_ids = row_start + lax.broadcasted_iota(jnp.int32, (tile_r, n_seg), 0)
    sim = jnp.where(row_ids < r_valid, sim, 0.0)

    # Per-step partial: mostly VALU vreg adds + a tiny sublane reduce; the
    # cross-block/cross-core reduce happens once, in the wrapper.
    partial = jnp.sum(sim, axis=0, keepdims=True)                        # (1, n_seg) f32
    out_ref[0:1, :] += partial


def similarity_loss_pallas(user_emb, sub_emb, *, max_tile_rows=None):
    """loss = 1 - mean(cosine_similarity(user_emb, sub_emb, dim=-1))."""
    assert user_emb.shape == sub_emb.shape and user_emb.ndim == 2
    B, D = user_emb.shape
    dtype = user_emb.dtype
    itemsize = jnp.dtype(dtype).itemsize

    # Lane packing: fold P consecutive rows into one 128-lane row (free, contiguous reshape).
    if D < 128 and 128 % D == 0 and B % (128 // D) == 0:
        P = 128 // D
    else:
        P = 1
    L = P * D
    n_seg = P
    R = B // P                            # true packed-row count

    u = user_emb.reshape(R, L)
    s = sub_emb.reshape(R, L)

    # Tiny-batch only: guarantee a single >=8-row block never exceeds the array extent.
    R_arr = R
    if R_arr < 8:
        pad = 8 - R_arr
        u = jnp.pad(u, ((0, pad), (0, 0)))
        s = jnp.pad(s, ((0, pad), (0, 0)))
        R_arr = 8

    # VMEM-budget-derived row tile: 2 inputs x 2 pipeline buffers + 3 elementwise temps
    # (all (tile_r, L) in storage dtype) + 3 f32 (tile_r, n_seg) MXU results.
    bytes_per_row = 7 * L * itemsize + 3 * n_seg * 4
    tile_r = _VMEM_TILE_BUDGET // bytes_per_row
    if max_tile_rows is not None:
        tile_r = min(tile_r, max_tile_rows)
    tile_r = min(tile_r, 8192, (R_arr // 8) * 8)
    tile_r = max(8, (tile_r // 8) * 8)

    n_blocks = -(-R_arr // tile_r)
    bpc = -(-n_blocks // _NCORES)         # row blocks handled per core

    # Static block-diagonal ones: seg[l, p] = 1 iff lane l belongs to segment p.
    seg_ones = jnp.asarray(
        (np.arange(L)[:, None] // D) == (np.arange(n_seg)[None, :]), dtype=dtype)

    precision = (lax.Precision.HIGHEST if dtype == jnp.float32
                 else lax.Precision.DEFAULT)

    def row_block(c, i):
        # Clamp so a spare (odd) step on the last core re-reads an in-bounds
        # block; the in-kernel row mask zeroes its contribution.
        return (jnp.minimum(c * bpc + i, n_blocks - 1), 0)

    kernel = functools.partial(_sim_loss_kernel,
                               r_valid=R, tile_r=tile_r, precision=precision)

    partials = pl.pallas_call(
        kernel,
        out_shape=jax.ShapeDtypeStruct((_NCORES * 8, n_seg), jnp.float32),
        grid=(_NCORES, bpc),
        in_specs=[
            pl.BlockSpec((tile_r, L), row_block),
            pl.BlockSpec((tile_r, L), row_block),
            pl.BlockSpec((L, n_seg), lambda c, i: (0, 0)),
        ],
        out_specs=pl.BlockSpec((8, n_seg), lambda c, i: (c, 0)),
        compiler_params=pltpu.CompilerParams(
            dimension_semantics=("parallel", "arbitrary"),
            vmem_limit_bytes=_VMEM_LIMIT,
        ),
    )(u, s, seg_ones)

    return 1.0 - jnp.sum(partials) / jnp.float32(B)


def _reference_loss(u, s):
    u = u.astype(jnp.float32)
    s = s.astype(jnp.float32)
    dot = jnp.sum(u * s, axis=-1)
    den = jnp.maximum(jnp.linalg.norm(u, axis=-1) * jnp.linalg.norm(s, axis=-1), _EPS)
    return 1.0 - jnp.mean(dot / den)


if __name__ == "__main__":
    key = jax.random.PRNGKey(0)
    k1, k2, k3, k4 = jax.random.split(key, 4)

    # --- small case matching the module's forward (f32, single row block) ---
    B, D = 8, 32
    user_embeddings = jax.random.normal(k1, (B, D), dtype=jnp.float32)
    subreddit_embeddings = jax.random.normal(k2, (B, D), dtype=jnp.float32)

    loss = jax.block_until_ready(
        similarity_loss_pallas(user_embeddings, subreddit_embeddings))
    ref = _reference_loss(user_embeddings, subreddit_embeddings)
    np.testing.assert_allclose(np.asarray(loss), np.asarray(ref),
                               rtol=1e-4, atol=1e-4)

    # --- larger, ragged, bf16 case (exercises multi-block accumulation,
    #     in-kernel edge masking and the core-parallel axis) ---
    B2, D2 = 100, 32
    u2 = jax.random.normal(k3, (B2, D2), dtype=jnp.bfloat16)
    s2 = jax.random.normal(k4, (B2, D2), dtype=jnp.bfloat16)
    loss2 = jax.block_until_ready(
        similarity_loss_pallas(u2, s2, max_tile_rows=8))
    ref2 = _reference_loss(u2, s2)
    np.testing.assert_allclose(np.asarray(loss2), np.asarray(ref2),
                               rtol=1e-2, atol=1e-2)

    print("KERNEL_OK")
</pallas_src>

<mosaic_0001>
module attributes {stable_mosaic.version = 11 : i64} {
  func.func @_sim_loss_kernel(%arg0: i32, %arg1: i32, %arg2: memref<8x128xf32, #tpu.memory_space<vmem>>, %arg3: memref<8x128xf32, #tpu.memory_space<vmem>>, %arg4: memref<128x4xf32, #tpu.memory_space<vmem>>, %arg5: memref<8x4xf32, #tpu.memory_space<vmem>>) attributes {dimension_semantics = [#tpu.dimension_semantics<parallel>, #tpu.dimension_semantics<arbitrary>], iteration_bounds = array<i64: 2, 1>, scalar_prefetch = 0 : i64, scratch_operands = 0 : i64, tpu.core_type = #tpu.core_type<tc>, window_params = [{transform_indices = @transform_0, window_bounds = array<i64: 8, 128>}, {transform_indices = @transform_1, window_bounds = array<i64: 8, 128>}, {pipeline_mode = #tpu.pipeline_mode<synchronous>, transform_indices = @transform_2, window_bounds = array<i64: 128, 4>}, {transform_indices = @transform_3, window_bounds = array<i64: 8, 4>}]} {
    %c0_i32 = arith.constant 0 : i32
    %0 = arith.cmpi eq, %arg1, %c0_i32 : i32
    %1 = arith.extui %0 : i1 to i32
    %c0_i32_0 = arith.constant 0 : i32
    %2 = arith.cmpi ne, %1, %c0_i32_0 : i32
    scf.if %2 {
      %cst_15 = arith.constant 0.000000e+00 : f32
      %32 = vector.broadcast %cst_15 : f32 to vector<8x4xf32>
      %c0_16 = arith.constant 0 : index
      %c0_17 = arith.constant 0 : index
      %33 = vector.load %arg5[%c0_16, %c0_17] : memref<8x4xf32, #tpu.memory_space<vmem>>, vector<8x4xf32>
      tpu.vector_store %arg5[%c0_16, %c0_17], %32 {strides = array<i32>} : memref<8x4xf32, #tpu.memory_space<vmem>>, vector<8x4xf32>,
    } else {
    }
    %c0 = arith.constant 0 : index
    %c0_1 = arith.constant 0 : index
    %3 = vector.load %arg2[%c0, %c0_1] : memref<8x128xf32, #tpu.memory_space<vmem>>, vector<8x128xf32>
    %c0_2 = arith.constant 0 : index
    %c0_3 = arith.constant 0 : index
    %4 = vector.load %arg3[%c0_2, %c0_3] : memref<8x128xf32, #tpu.memory_space<vmem>>, vector<8x128xf32>
    %c0_4 = arith.constant 0 : index
    %c0_5 = arith.constant 0 : index
    %5 = vector.load %arg4[%c0_4, %c0_5] : memref<128x4xf32, #tpu.memory_space<vmem>>, vector<128x4xf32>
    %6 = arith.mulf %3, %4 : vector<8x128xf32>
    %7 = arith.mulf %3, %3 : vector<8x128xf32>
    %8 = arith.mulf %4, %4 : vector<8x128xf32>
    %cst = arith.constant dense<0.000000e+00> : vector<8x4xf32>
    %9 = tpu.matmul %6, %5, %cst {dimension_numbers = #tpu.dot_dimension_numbers<[1], [0], [0], [1], [0, 0, 1, 1], [], []>, precision = #tpu.contract_precision<fp32>} : vector<8x128xf32>, vector<128x4xf32>, vector<8x4xf32> -> vector<8x4xf32>
    %cst_6 = arith.constant dense<0.000000e+00> : vector<8x4xf32>
    %10 = tpu.matmul %7, %5, %cst_6 {dimension_numbers = #tpu.dot_dimension_numbers<[1], [0], [0], [1], [0, 0, 1, 1], [], []>, precision = #tpu.contract_precision<fp32>} : vector<8x128xf32>, vector<128x4xf32>, vector<8x4xf32> -> vector<8x4xf32>
    %cst_7 = arith.constant dense<0.000000e+00> : vector<8x4xf32>
    %11 = tpu.matmul %8, %5, %cst_7 {dimension_numbers = #tpu.dot_dimension_numbers<[1], [0], [0], [1], [0, 0, 1, 1], [], []>, precision = #tpu.contract_precision<fp32>} : vector<8x128xf32>, vector<128x4xf32>, vector<8x4xf32> -> vector<8x4xf32>
    %12 = arith.mulf %10, %11 : vector<8x4xf32>
    %cst_8 = arith.constant 1.000000e-16 : f32
    %13 = vector.broadcast %cst_8 : f32 to vector<8x4xf32>
    %14 = arith.maximumf %12, %13 : vector<8x4xf32>
    %15 = math.rsqrt %14 : vector<8x4xf32>
    %16 = arith.mulf %9, %15 : vector<8x4xf32>
    %c1_i32 = arith.constant 1 : i32
    %17 = arith.muli %arg0, %c1_i32 : i32
    %18 = arith.addi %17, %arg1 : i32
    %c8_i32 = arith.constant 8 : i32
    %19 = arith.muli %18, %c8_i32 : i32
    %20 = tpu.iota {dimensions = array<i32: 0>} : vector<8x4xi32>
    %21 = vector.broadcast %19 : i32 to vector<8x4xi32>
    %22 = arith.addi %21, %20 : vector<8x4xi32>
    %c2_i32 = arith.constant 2 : i32
    %23 = vector.broadcast %c2_i32 : i32 to vector<8x4xi32>
    %24 = arith.cmpi slt, %22, %23 : vector<8x4xi32>
    %cst_9 = arith.constant 0.000000e+00 : f32
    %25 = vector.broadcast %cst_9 : f32 to vector<8x4xf32>
    %26 = arith.select %24, %16, %25 : vector<8x4xi1>, vector<8x4xf32>
    %cst_10 = arith.constant dense<0.000000e+00> : vector<4xf32>
    %27 = vector.multi_reduction <add>, %26, %cst_10 [0] : vector<8x4xf32> to vector<4xf32>
    %28 = vector.shape_cast %27 : vector<4xf32> to vector<1x4xf32>
    %c0_11 = arith.constant 0 : index
    %c0_12 = arith.constant 0 : index
    %29 = vector.load %arg5[%c0_11, %c0_12] : memref<8x4xf32, #tpu.memory_space<vmem>>, vector<1x4xf32>
    %30 = arith.addf %29, %28 : vector<1x4xf32>
    %c0_13 = arith.constant 0 : index
    %c0_14 = arith.constant 0 : index
    %31 = vector.load %arg5[%c0_13, %c0_14] : memref<8x4xf32, #tpu.memory_space<vmem>>, vector<1x4xf32>
    tpu.vector_store %arg5[%c0_13, %c0_14], %30 {strides = array<i32>} : memref<8x4xf32, #tpu.memory_space<vmem>>, vector<1x4xf32>,
    return
  }
  func.func @transform_0(%arg0: i32, %arg1: i32) -> (i32, i32) {
    %c1_i32 = arith.constant 1 : i32
    %0 = arith.muli %arg0, %c1_i32 : i32
    %1 = arith.addi %0, %arg1 : i32
    %c0_i32 = arith.constant 0 : i32
    %2 = arith.minsi %1, %c0_i32 : i32
    %c0_i32_0 = arith.constant 0 : i32
    %c0_i32_1 = arith.constant 0 : i32
    return %2, %c0_i32_0 : i32, i32
  }
  func.func @transform_1(%arg0: i32, %arg1: i32) -> (i32, i32) {
    %c1_i32 = arith.constant 1 : i32
    %0 = arith.muli %arg0, %c1_i32 : i32
    %1 = arith.addi %0, %arg1 : i32
    %c0_i32 = arith.constant 0 : i32
    %2 = arith.minsi %1, %c0_i32 : i32
    %c0_i32_0 = arith.constant 0 : i32
    %c0_i32_1 = arith.constant 0 : i32
    return %2, %c0_i32_0 : i32, i32
  }
  func.func @transform_2(%arg0: i32, %arg1: i32) -> (i32, i32) {
    %c0_i32 = arith.constant 0 : i32
    %c0_i32_0 = arith.constant 0 : i32
    %c0_i32_1 = arith.constant 0 : i32
    return %c0_i32, %c0_i32_0 : i32, i32
  }
  func.func @transform_3(%arg0: i32, %arg1: i32) -> (i32, i32) {
    %c0_i32 = arith.constant 0 : i32
    %c0_i32_0 = arith.constant 0 : i32
    return %arg0, %c0_i32 : i32, i32
  }
}

</mosaic_0001>

<bundles_post_ra>
// kernel: tpu_custom_call.1
= control target key start
LH: loop header
LB: loop body
LE: loop exit
PB: predicated region body
PF: predicated region fallthrough
CT: control target
= control target key end

     0   :  { %s1482_s12 = smov 0   ;;  %s1484_s13 = smov 0   ;;  %s2094_s0 = inlined_call_operand.vmem [shape: f32[8,128], index: 0, kind: input, shape index: {}]   ;;  %s2095_s1 = inlined_call_operand.vmem [shape: f32[8,128], index: 1, kind: input, shape index: {}]   ;;  %s2096_s2 = inlined_call_operand.vmem [shape: f32[128,4], index: 2, kind: input, shape index: {}]   ;;  %s2097_s3 = inlined_call_operand.vmem [shape: f32[16,4], index: 3, kind: output, shape index: {}]  }
   0x1   :  { %s1486_s14 = smov 0  }
   0x2 LB: > { %s25_s15 = sadd.s32 1, %s1455_s13  ;;  %p1397_p0 = scmp.ge.s32.totalorder %s1459_s14, 1  ;;  %s1459_s14 = sphi %s1486_s14, %s13_s14   ;;  %s1455_s13 = sphi %s1484_s13, %s2140_s13   ;;  %s1451_s12 = sphi %s1482_s12, %s2139_s12  }
   0x3   : > { %p27_p1 = scmp.ge.s32.totalorder %s25_s15, 2  ;;  %p181_p2 = scmp.lt.s32.totalorder %s1459_s14, 3 }
   0x5   : > { %s2142_s15 = smov (%p27_p1, %s25_s15), 0  ;;  %p182_p3 = pnand %p1397_p0, %p181_p2 }
   0x7   : > { %185 = sbr.rel (%p182_p3) target bundleno = 351 (0x15f), region = 32 }
   0xc   : > { %v260_v0 = vld [vmem:[%s2096_s2 + $0x78] sm:$0xff]  ;;  %v259_v1 = vld [vmem:[%s2096_s2 + $0x70] sm:$0xff]  ;;  %v258_v2 = vld [vmem:[%s2096_s2 + $0x68] sm:$0xff]  ;;  %p214_p4 = scmp.lt.s32.totalorder %s1451_s12, 0  ;;  %p233_p5 = scmp.lt.s32.totalorder %s1451_s12, 1  ;;  %vm241_vm0 = vcmask 31744  }
   0xd   : > { %v1511_v3 = vand.u32 4294901760, %v260_v0  ;;  %v1513_v4 = vand.u32 4294901760, %v259_v1  ;;  %v1515_v5 = vand.u32 4294901760, %v258_v2  ;;  %v257_v6 = vld [vmem:[%s2096_s2 + $0x60] sm:$0xff]  ;;  %v256_v7 = vld [vmem:[%s2096_s2 + $0x58] sm:$0xff]  ;;  %v255_v8 = vld [vmem:[%s2096_s2 + $0x50] sm:$0xff] }
   0xe   : > { %v1526_v9 = vand.u32 4294901760, %v257_v6  ;;  %v1528_v10 = vand.u32 4294901760, %v256_v7  ;;  %v1530_v11 = vand.u32 4294901760, %v255_v8  ;;  %v254_v12 = vld [vmem:[%s2096_s2 + $0x48] sm:$0xff]  ;;  %v253_v13 = vld [vmem:[%s2096_s2 + $0x40] sm:$0xff]  ;;  %v252_v18 = vld [vmem:[%s2096_s2 + $0x38] sm:$0xff] }
   0xf   : > { %265 = vmatpush.msra.mxu0 %v1511_v3  ;;  %v1540_v14 = vsub.f32 %v260_v0, %v1511_v3  ;;  %v1543_v15 = vsub.f32 %v259_v1, %v1513_v4  ;;  %v1546_v16 = vsub.f32 %v258_v2, %v1515_v5  ;;  %v1548_v17 = vand.u32 4294901760, %v254_v12  ;;  %461 = vmatpush.msra.mxu3 %v1511_v3  ;;  %v251_v26 = vld [vmem:[%s2096_s2 + $0x30] sm:$0xff]  ;;  %v250_v36 = vld [vmem:[%s2096_s2 + $0x28] sm:$0xff]  ;;  %v249_v41 = vld [vmem:[%s2096_s2 + $0x20] sm:$0xff]  ;;  %s215_s17 = scalar_select %p214_p4, %s1451_s12, 0 }
  0x10   : > { %v1555_v19 = vsub.f32 %v257_v6, %v1526_v9  ;;  %v1558_v20 = vsub.f32 %v256_v7, %v1528_v10  ;;  %v1561_v21 = vsub.f32 %v255_v8, %v1530_v11  ;;  %v1573_v25 = vand.u32 4294901760, %v253_v13  ;;  %v248_v48 = vld [vmem:[%s2096_s2 + $0x18] sm:$0xff]  ;;  %v247_v54 = vld [vmem:[%s2096_s2 + $0x10] sm:$0xff]  ;;  %v246_v60 = vld [vmem:[%s2096_s2 + $0x8] sm:$0xff]  ;;  %s234_s6 = scalar_select %p233_p5, %s1451_s12, 1 }
  0x11   : > { %267 = vmatpush.msra.mxu0 %v1513_v4  ;;  %v1565_v22 = vand.u32 4294901760, %v1540_v14  ;;  %v1568_v23 = vand.u32 4294901760, %v1543_v15  ;;  %v1571_v24 = vand.u32 4294901760, %v1546_v16  ;;  %408 = vmatpush.msra.mxu2 %v1540_v14  ;;  %v1582_v28 = vand.u32 4294901760, %v252_v18  ;;  %s2144_s17 = smov (!%p214_p4, %s215_s17), 0  ;;  %v245_v2 = vld [vmem:[%s2096_s2] sm:$0xff] }
  0x12   : > { %v1580_v27 = vand.u32 4294901760, %v1555_v19  ;;  %v1585_v29 = vsub.f32 %v254_v12, %v1548_v17  ;;  %463 = vmatpush.msra.mxu3 %v1513_v4  ;;  %v1597_v33 = vand.u32 4294901760, %v1558_v20  ;;  %v1601_v34 = vand.u32 4294901760, %v1561_v21  ;;  %s1401_s26 = sshll.u32 %s2144_s17, 3  ;;  %s1406_s7 = sshll.u32 %s234_s6, 3 }
  0x13   : > { %269 = vmatpush.msra.mxu0 %v1515_v5  ;;  %v308_v30 = vsub.f32 %v1540_v14, %v1565_v22  ;;  %v314_v31 = vsub.f32 %v1543_v15, %v1568_v23  ;;  %v320_v32 = vsub.f32 %v1546_v16, %v1571_v24  ;;  %411 = vmatpush.msra.mxu2 %v1543_v15  ;;  %v1603_v35 = vand.u32 4294901760, %v251_v26  ;;  %s219_s29 = scalar_lea.vmem %s2094_s0, %s1401_s26  ;;  %s229_s5 = scalar_lea.vmem %s2095_s1, %s1401_s26 }
  0x14   : > { %2115 = vst [vmem:[#allocation2_spill] sm:$0xff] %v1597_v33  ;;  %465 = vmatpush.msra.mxu3 %v1515_v5  ;;  %v326_v39 = vsub.f32 %v1555_v19, %v1580_v27  ;;  %v1617_v40 = vsub.f32 %v253_v13, %v1573_v25  ;;  %v1624_v42 = vand.u32 4294901760, %v1585_v29  ;;  %v332_v44 = vsub.f32 %v1558_v20, %v1597_v33  ;;  %s2077_s10 = scalar_lea.vmem %s2097_s3, %s1406_s7  ;;  %s1407_s11 = sshll.u32 %s1451_s12, 3 }
  0x15   : > { %v1609_v37 = vand.u32 4294901760, %v308_v30  ;;  %271 = vmatpush.msra.mxu0 %v1526_v9  ;;  %v1612_v38 = vand.u32 4294901760, %v314_v31  ;;  %414 = vmatpush.msra.mxu2 %v1546_v16  ;;  %v1632_v43 = vand.u32 4294901760, %v320_v32  ;;  %v1636_v45 = vand.u32 4294901760, %v250_v36 }
  0x16   : > { %2116 = vst [vmem:[#allocation3_spill] sm:$0xff] %v1624_v42  ;;  %467 = vmatpush.msra.mxu3 %v1526_v9  ;;  %v1639_v46 = vsub.f32 %v252_v18, %v1582_v28  ;;  %v1641_v47 = vand.u32 4294901760, %v249_v41  ;;  %v1650_v49 = vand.u32 4294901760, %v326_v39  ;;  %v338_v50 = vsub.f32 %v1561_v21, %v1601_v34 }
  0x17   : > { %310 = vmatpush.msra.mxu1 %v1609_v37  ;;  %273 = vmatpush.msra.mxu0 %v1528_v10  ;;  %v1655_v51 = vand.u32 4294901760, %v1617_v40  ;;  %v1658_v52 = vsub.f32 %v251_v26, %v1603_v35  ;;  %v344_v53 = vsub.f32 %v1585_v29, %v1624_v42  ;;  %v1673_v55 = vand.u32 4294901760, %v332_v44 }
  0x18   : > { %2117 = vst [vmem:[#allocation4_spill] sm:$0xff] %v1639_v46  ;;  %417 = vmatpush.msra.mxu2 %v1555_v19  ;;  %469 = vmatpush.msra.mxu3 %v1528_v10  ;;  %v1676_v56 = vand.u32 4294901760, %v1639_v46  ;;  %v1678_v57 = vand.u32 4294901760, %v248_v48  ;;  %v1681_v58 = vsub.f32 %v250_v36, %v1636_v45  ;;  %v1684_v59 = vsub.f32 %v249_v41, %v1641_v47 }
  0x19   : > { %316 = vmatpush.msra.mxu1 %v1612_v38  ;;  %275 = vmatpush.msra.mxu0 %v1530_v11  ;;  %2118 = vst [vmem:[#allocation5_spill] sm:$0xff] %v1658_v52  ;;  %v1693_v61 = vand.u32 4294901760, %v338_v50  ;;  %v350_v62 = vsub.f32 %v1617_v40, %v1655_v51  ;;  %v1698_v63 = vand.u32 4294901760, %v1658_v52  ;;  %v1700_v0 = vand.u32 4294901760, %v247_v54  ;;  %v1764_v50 = vld [vmem:[%s229_s5] sm:$0xff] }
  0x1a   : > { %420 = vmatpush.msra.mxu2 %v1558_v20  ;;  %471 = vmatpush.msra.mxu3 %v1530_v11  ;;  %2119 = vst [vmem:[#allocation6_spill] sm:$0xff] %v1681_v58  ;;  %v1702_v1 = vand.u32 4294901760, %v344_v53  ;;  %v356_v6 = vsub.f32 %v1639_v46, %v1676_v56  ;;  %v1715_v7 = vand.u32 4294901760, %v1681_v58  ;;  %v1717_v8 = vand.u32 4294901760, %v246_v60 }
  0x1b   : > { %322 = vmatpush.msra.mxu1 %v1632_v43  ;;  %277 = vmatpush.msra.mxu0 %v1548_v17  ;;  %2120 = vst [vmem:[#allocation7_spill] sm:$0xff] %v1684_v59  ;;  %v1720_v12 = vsub.f32 %v248_v48, %v1678_v57  ;;  %v1723_v13 = vand.u32 4294901760, %v1684_v59  ;;  %v1729_v18 = vand.u32 4294901760, %v350_v62  ;;  %v362_v26 = vsub.f32 %v1658_v52, %v1698_v63  ;;  %v1762_v48 = vld [vmem:[%s219_s29] sm:$0xff] }
  0x1c   : > { %423 = vmatpush.msra.mxu2 %v1561_v21  ;;  %473 = vmatpush.msra.mxu3 %v1548_v17  ;;  %v1733_v30 = vand.u32 4294901760, %v245_v2  ;;  %v1736_v31 = vsub.f32 %v247_v54, %v1700_v0  ;;  %v1748_v32 = vand.u32 4294901760, %v356_v6  ;;  %v368_v36 = vsub.f32 %v1681_v58, %v1715_v7  ;;  %2124 = vst [vmem:[#allocation11_spill] sm:$0xff] %v1762_v48 }
  0x1d   : > { %328 = vmatpush.msra.mxu1 %v1650_v49  ;;  %279 = vmatpush.msra.mxu0 %v1573_v25  ;;  %2121 = vst [vmem:[#allocation8_spill] sm:$0xff] %v1720_v12  ;;  %v1753_v39 = vand.u32 4294901760, %v1720_v12  ;;  %v1756_v41 = vsub.f32 %v246_v60, %v1717_v8  ;;  %v374_v44 = vsub.f32 %v1684_v59, %v1723_v13  ;;  %v1768_v53 = vand.u32 4294901760, %v362_v26 }
  0x1e   : > { %426 = vmatpush.msra.mxu2 %v1585_v29  ;;  %475 = vmatpush.msra.mxu3 %v1573_v25  ;;  %2125 = vst [vmem:[#allocation12_spill] sm:$0xff] %v1764_v50  ;;  %v1771_v54 = vand.u32 4294901760, %v1736_v31  ;;  %v1774_v60 = vsub.f32 %v245_v2, %v1733_v30  ;;  %v261_v62 = vmul.f32 %v1764_v50, %v1762_v48  ;;  %v1782_v6 = vand.u32 4294901760, %v368_v36 }
  0x1f   : > { %334 = vmatpush.msra.mxu1 %v1673_v55  ;;  %281 = vmatpush.msra.mxu0 %v1582_v28  ;;  %2122 = vst [vmem:[#allocation9_spill] sm:$0xff] %v1753_v39  ;;  %v380_v26 = vsub.f32 %v1720_v12, %v1753_v39  ;;  %v1795_v50 = vand.u32 4294901760, %v374_v44  ;;  %vm1318_vm5 = vcmask 24576  }
  0x20   : > { %429 = vmatpush.msra.mxu2 %v1617_v40  ;;  %477 = vmatpush.msra.mxu3 %v1582_v28  ;;  %2123 = vst [vmem:[#allocation10_spill] sm:$0xff] %v1756_v41  ;;  %v1789_v2 = vand.u32 4294901760, %v261_v62  ;;  %v386_v36 = vsub.f32 %v1736_v31, %v1771_v54 }
  0x21   : > { %340 = vmatpush.msra.mxu1 %v1693_v61  ;;  %283 = vmatpush.msra.mxu0 %v1603_v35 }
  0x22   : > { %432 = vmatpush.msra.mxu2 %v1639_v46  ;;  %479 = vmatpush.msra.mxu3 %v1603_v35  ;;  %v297_v48 = vsub.f32 %v261_v62, %v1789_v2 }
  0x23   : > { %346 = vmatpush.msra.mxu1 %v1702_v1  ;;  %285 = vmatpush.msra.mxu0 %v1636_v45 }
  0x24   : > { %435 = vmatpush.msra.mxu2 %v1658_v52  ;;  %481 = vmatpush.msra.mxu3 %v1636_v45  ;;  %v1787_v52 = vand.u32 4294901760, %v1756_v41 }
  0x25   : > { %352 = vmatpush.msra.mxu1 %v1729_v18  ;;  %287 = vmatpush.msra.mxu0 %v1641_v47 }
  0x26   : > { %438 = vmatpush.msra.mxu2 %v1681_v58  ;;  %483 = vmatpush.msra.mxu3 %v1641_v47  ;;  %v1800_v58 = vand.u32 4294901760, %v1774_v60  ;;  %v392_v44 = vsub.f32 %v1756_v41, %v1787_v52 }
  0x27   : > { %358 = vmatpush.msra.mxu1 %v1748_v32  ;;  %289 = vmatpush.msra.mxu0 %v1678_v57 }
  0x28   : > { %441 = vmatpush.msra.mxu2 %v1684_v59  ;;  %485 = vmatpush.msra.mxu3 %v1678_v57  ;;  %v1806_v59 = vand.u32 4294901760, %v380_v26  ;;  %v398_v46 = vsub.f32 %v1774_v60, %v1800_v58  ;;  %v1822_v62 = vand.u32 4294901760, %v392_v44  ;;  %v298_v26 = vand.u32 4294901760, %v297_v48 }
  0x29   : > { %364 = vmatpush.msra.mxu1 %v1768_v53  ;;  %291 = vmatpush.msra.mxu0 %v1700_v0 }
  0x2a   : > { %444 = vmatpush.msra.mxu2 %v1720_v12  ;;  %487 = vmatpush.msra.mxu3 %v1700_v0  ;;  %v1815_v12 = vand.u32 4294901760, %v386_v36  ;;  %v1828_v36 = vand.u32 4294901760, %v398_v46  ;;  %v299_v44 = vsub.f32 %v297_v48, %v298_v26 }
  0x2b   : > { %370 = vmatpush.msra.mxu1 %v1782_v6  ;;  %293 = vmatpush.msra.mxu0 %v1717_v8 }
  0x2c   : > { %447 = vmatpush.msra.mxu2 %v1736_v31  ;;  %489 = vmatpush.msra.mxu3 %v1717_v8  ;;  %2126 = vst [vmem:[#allocation13_spill] sm:$0xff] %v1828_v36  ;;  %v300_v46 = vand.u32 4294901760, %v299_v44 }
  0x2d   : > { %376 = vmatpush.msra.mxu1 %v1795_v50  ;;  %295 = vmatpush.msra.mxu0 %v1733_v30 }
  0x2e   : > { %450 = vmatpush.msra.mxu2 %v1756_v41  ;;  %491 = vmatpush.msra.mxu3 %v1733_v30 }
  0x2f   : > { %502 = vmatpush.msrb.mxu0 %v1565_v22  ;;  %382 = vmatpush.msra.mxu1 %v1806_v59 }
  0x30   : > { %453 = vmatpush.msra.mxu2 %v1774_v60  ;;  %651 = vmatpush.msrb.mxu3 %v1609_v37 }
  0x31   : > { %506 = vmatpush.msrb.mxu0 %v1568_v23  ;;  %388 = vmatpush.msra.mxu1 %v1815_v12 }
  0x32   : > { %606 = vmatpush.msrb.mxu2 %v1511_v3  ;;  %657 = vmatpush.msrb.mxu3 %v1612_v38 }
  0x33   : > { %510 = vmatpush.msrb.mxu0 %v1571_v24  ;;  %394 = vmatpush.msra.mxu1 %v1822_v62 }
  0x34   : > { %608 = vmatpush.msrb.mxu2 %v1513_v4  ;;  %663 = vmatpush.msrb.mxu3 %v1632_v43 }
  0x35   : > { %514 = vmatpush.msrb.mxu0 %v1580_v27  ;;  %400 = vmatpush.msra.mxu1 %v1828_v36 }
  0x36   : > { %610 = vmatpush.msrb.mxu2 %v1515_v5  ;;  %669 = vmatpush.msrb.mxu3 %v1650_v49 }
  0x37   : > { %569 = vmatpush.msrb.mxu1 %v1511_v3  ;;  %518 = vmatpush.msrb.mxu0 %v1597_v33 }
  0x38   : > { %612 = vmatpush.msrb.mxu2 %v1526_v9  ;;  %301 = vmatmul.f32.vlgmr.msra.gmra.mxu0 %v300_v46  ;;  %v2130_v46 = vld [vmem:[#allocation6_spill] sm:$0xff] }
  0x39   : > { %571 = vmatpush.msrb.mxu1 %v1513_v4  ;;  %522 = vmatpush.msrb.mxu0 %v1601_v34 }
  0x3a   : > { %456 = vmatmul.f32.vlgmr.msra.gmra.mxu2 %v297_v48  ;;  %495 = vmatmul.f32.vlgmr.msra.gmra.mxu3 %v298_v26  ;;  %v2127_v48 = vld [vmem:[#allocation4_spill] sm:$0xff]  ;;  %v2129_v26 = vld [vmem:[#allocation11_spill] sm:$0xff] }
  0x3b   : > { %573 = vmatpush.msrb.mxu1 %v1515_v5  ;;  %526 = vmatpush.msrb.mxu0 %v1624_v42  ;;  %v262_v44 = vmul.f32 %v2129_v26, %v2129_v26  ;;  %v2132_v26 = vld [vmem:[#allocation8_spill] sm:$0xff] }
  0x3c   : > { %614 = vmatpush.msrb.mxu2 %v1528_v10  ;;  %675 = vmatpush.msrb.mxu3 %v1673_v55 }
  0x3d   : > { %575 = vmatpush.msrb.mxu1 %v1526_v9  ;;  %530 = vmatpush.msrb.mxu0 %v1655_v51 }
  0x3e   : > { %616 = vmatpush.msrb.mxu2 %v1530_v11  ;;  %402 = vmatmul.f32.vlgmr.msra.gmra.mxu1 %v1789_v2 }
  0x3f   : > { %577 = vmatpush.msrb.mxu1 %v1528_v10  ;;  %534 = vmatpush.msrb.mxu0 %v1676_v56 }
  0x40   : > { %618 = vmatpush.msrb.mxu2 %v1548_v17  ;;  %681 = vmatpush.msrb.mxu3 %v1693_v61 }
  0x41   : > { %579 = vmatpush.msrb.mxu1 %v1530_v11  ;;  %538 = vmatpush.msrb.mxu0 %v1698_v63 }
  0x42   : > { %620 = vmatpush.msrb.mxu2 %v1573_v25  ;;  %687 = vmatpush.msrb.mxu3 %v1702_v1 }
  0x43   : > { %581 = vmatpush.msrb.mxu1 %v1548_v17  ;;  %542 = vmatpush.msrb.mxu0 %v1715_v7 }
  0x44   : > { %622 = vmatpush.msrb.mxu2 %v1582_v28  ;;  %693 = vmatpush.msrb.mxu3 %v1729_v18 }
  0x45   : > { %583 = vmatpush.msrb.mxu1 %v1573_v25  ;;  %546 = vmatpush.msrb.mxu0 %v1723_v13 }
  0x46   : > { %624 = vmatpush.msrb.mxu2 %v1603_v35  ;;  %699 = vmatpush.msrb.mxu3 %v1748_v32 }
  0x47   : > { %585 = vmatpush.msrb.mxu1 %v1582_v28  ;;  %550 = vmatpush.msrb.mxu0 %v1753_v39 }
  0x48   : > { %626 = vmatpush.msrb.mxu2 %v1636_v45  ;;  %705 = vmatpush.msrb.mxu3 %v1768_v53 }
  0x49   : > { %587 = vmatpush.msrb.mxu1 %v1603_v35  ;;  %554 = vmatpush.msrb.mxu0 %v1771_v54 }
  0x4a   : > { %628 = vmatpush.msrb.mxu2 %v1641_v47  ;;  %711 = vmatpush.msrb.mxu3 %v1782_v6 }
  0x4b   : > { %589 = vmatpush.msrb.mxu1 %v1636_v45  ;;  %558 = vmatpush.msrb.mxu0 %v1787_v52 }
  0x4c   : > { %630 = vmatpush.msrb.mxu2 %v1678_v57  ;;  %717 = vmatpush.msrb.mxu3 %v1795_v50 }
  0x4d   : > { %591 = vmatpush.msrb.mxu1 %v1641_v47  ;;  %562 = vmatpush.msrb.mxu0 %v1800_v58 }
  0x4e   : > { %564 = vmatmul.f32.vlgmr.msrb.gmra.mxu0 %v1789_v2  ;;  %632 = vmatpush.msrb.mxu2 %v1700_v0 }
  0x4f   : > { %749 = vmatpush.msra.mxu0 %v1540_v14  ;;  %593 = vmatpush.msrb.mxu1 %v1678_v57 }
  0x50   : > { %723 = vmatpush.msrb.mxu3 %v1806_v59  ;;  %634 = vmatpush.msrb.mxu2 %v1717_v8 }
  0x51   : > { %752 = vmatpush.msra.mxu0 %v1543_v15  ;;  %595 = vmatpush.msrb.mxu1 %v1700_v0 }
  0x52   : > { %729 = vmatpush.msrb.mxu3 %v1815_v12  ;;  %636 = vmatpush.msrb.mxu2 %v1733_v30 }
  0x53   : > { %755 = vmatpush.msra.mxu0 %v1546_v16  ;;  %597 = vmatpush.msrb.mxu1 %v1717_v8 }
  0x54   : > { %735 = vmatpush.msrb.mxu3 %v1822_v62  ;;  %843 = vmatpush.msra.mxu2 %v1565_v22 }
  0x55   : > { %758 = vmatpush.msra.mxu0 %v1555_v19  ;;  %599 = vmatpush.msrb.mxu1 %v1733_v30 }
  0x56   : > { %601 = vmatmul.f32.vlgmr.msrb.gmra.mxu1 %v1789_v2  ;;  %741 = vmatpush.msrb.mxu3 %v1828_v36  ;;  %v2128_v2 = vld [vmem:[#allocation5_spill] sm:$0xff]  ;;  %v2131_v36 = vld [vmem:[#allocation7_spill] sm:$0xff] }
  0x57   : > { %802 = vmatpush.msra.mxu1 %v1511_v3  ;;  %761 = vmatpush.msra.mxu0 %v1558_v20 }
  0x58   : > { %847 = vmatpush.msra.mxu2 %v1568_v23  ;;  %910 = vmatpush.msra.mxu3 %v1511_v3 }
  0x59   : > { %804 = vmatpush.msra.mxu1 %v1513_v4  ;;  %764 = vmatpush.msra.mxu0 %v1561_v21 }
  0x5a   : > { %851 = vmatpush.msra.mxu2 %v1571_v24  ;;  %912 = vmatpush.msra.mxu3 %v1513_v4 }
  0x5b   : > { %806 = vmatpush.msra.mxu1 %v1515_v5  ;;  %767 = vmatpush.msra.mxu0 %v1585_v29 }
  0x5c   : > { %855 = vmatpush.msra.mxu2 %v1580_v27  ;;  %914 = vmatpush.msra.mxu3 %v1515_v5 }
  0x5d   : > { %808 = vmatpush.msra.mxu1 %v1526_v9  ;;  %770 = vmatpush.msra.mxu0 %v1617_v40 }
  0x5e   : > { %859 = vmatpush.msra.mxu2 %v1597_v33  ;;  %916 = vmatpush.msra.mxu3 %v1526_v9  ;;  %v1932_v33 = vand.u32 4294901760, %v262_v44 }
  0x5f   : > { %810 = vmatpush.msra.mxu1 %v1528_v10  ;;  %773 = vmatpush.msra.mxu0 %v2127_v48 }
  0x60   : > { %863 = vmatpush.msra.mxu2 %v1601_v34  ;;  %918 = vmatpush.msra.mxu3 %v1528_v10 }
  0x61   : > { %812 = vmatpush.msra.mxu1 %v1530_v11  ;;  %776 = vmatpush.msra.mxu0 %v2128_v2 }
  0x62   : > { %867 = vmatpush.msra.mxu2 %v1624_v42  ;;  %920 = vmatpush.msra.mxu3 %v1530_v11  ;;  %v1945_v42 = vsub.f32 %v262_v44, %v1932_v33 }
  0x63   : > { %814 = vmatpush.msra.mxu1 %v1548_v17  ;;  %779 = vmatpush.msra.mxu0 %v2130_v46 }
  0x64   : > { %871 = vmatpush.msra.mxu2 %v1655_v51  ;;  %922 = vmatpush.msra.mxu3 %v1548_v17 }
  0x65   : > { %816 = vmatpush.msra.mxu1 %v1573_v25  ;;  %782 = vmatpush.msra.mxu0 %v2131_v36 }
  0x66   : > { %875 = vmatpush.msra.mxu2 %v1676_v56  ;;  %924 = vmatpush.msra.mxu3 %v1573_v25 }
  0x67   : > { %818 = vmatpush.msra.mxu1 %v1582_v28  ;;  %785 = vmatpush.msra.mxu0 %v2132_v26 }
  0x68   : > { %879 = vmatpush.msra.mxu2 %v1698_v63  ;;  %926 = vmatpush.msra.mxu3 %v1582_v28 }
  0x69   : > { %820 = vmatpush.msra.mxu1 %v1603_v35  ;;  %788 = vmatpush.msra.mxu0 %v1736_v31 }
  0x6a   : > { %883 = vmatpush.msra.mxu2 %v1715_v7  ;;  %928 = vmatpush.msra.mxu3 %v1603_v35 }
  0x6b   : > { %822 = vmatpush.msra.mxu1 %v1636_v45  ;;  %791 = vmatpush.msra.mxu0 %v1756_v41  ;;  %v639_v41 = vand.u32 4294901760, %v1945_v42 }
  0x6c   : > { %887 = vmatpush.msra.mxu2 %v1723_v13  ;;  %930 = vmatpush.msra.mxu3 %v1636_v45 }
  0x6d   : > { %824 = vmatpush.msra.mxu1 %v1641_v47  ;;  %794 = vmatpush.msra.mxu0 %v1774_v60  ;;  %v640_v44 = vsub.f32 %v1945_v42, %v639_v41 }
  0x6e   : > { %891 = vmatpush.msra.mxu2 %v1753_v39  ;;  %932 = vmatpush.msra.mxu3 %v1641_v47 }
  0x6f   : > { %947 = vmatpush.msrb.mxu0 %v1511_v3  ;;  %826 = vmatpush.msra.mxu1 %v1678_v57  ;;  %v641_v39 = vand.u32 4294901760, %v640_v44 }
  0x70   : > { %895 = vmatpush.msra.mxu2 %v1771_v54  ;;  %934 = vmatpush.msra.mxu3 %v1678_v57 }
  0x71   : > { %949 = vmatpush.msrb.mxu0 %v1513_v4  ;;  %828 = vmatpush.msra.mxu1 %v1700_v0 }
  0x72   : > { %899 = vmatpush.msra.mxu2 %v1787_v52  ;;  %936 = vmatpush.msra.mxu3 %v1700_v0 }
  0x73   : > { %951 = vmatpush.msrb.mxu0 %v1515_v5  ;;  %830 = vmatpush.msra.mxu1 %v1717_v8 }
  0x74   : > { %903 = vmatpush.msra.mxu2 %v1800_v58  ;;  %938 = vmatpush.msra.mxu3 %v1717_v8 }
  0x75   : > { %953 = vmatpush.msrb.mxu0 %v1526_v9  ;;  %832 = vmatpush.msra.mxu1 %v1733_v30 }
  0x76   : > { %642 = vmatmul.f32.vlgmr.msrb.gmra.mxu2 %v641_v39  ;;  %940 = vmatpush.msra.mxu3 %v1733_v30 }
  0x77   : > { %992 = vmatpush.msrb.mxu1 %v1609_v37  ;;  %955 = vmatpush.msrb.mxu0 %v1528_v10 }
  0x78   : > { %1090 = vmatpush.msrb.mxu2 %v1540_v14  ;;  %743 = vmatmul.f32.vlgmr.msrb.gmra.mxu3 %v1932_v33  ;;  %v2133_v14 = vld [vmem:[#allocation12_spill] sm:$0xff] }
  0x79   : > { %998 = vmatpush.msrb.mxu1 %v1612_v38  ;;  %957 = vmatpush.msrb.mxu0 %v1530_v11 }
  0x7a   : > { %1093 = vmatpush.msrb.mxu2 %v1543_v15  ;;  %1143 = vmatpush.msrb.mxu3 %v1511_v3  ;;  %v263_v15 = vmul.f32 %v2133_v14, %v2133_v14 }
  0x7b   : > { %1004 = vmatpush.msrb.mxu1 %v1632_v43  ;;  %959 = vmatpush.msrb.mxu0 %v1548_v17 }
  0x7c   : > { %1096 = vmatpush.msrb.mxu2 %v1546_v16  ;;  %1145 = vmatpush.msrb.mxu3 %v1513_v4  ;;  %v978_v16 = vand.u32 4294901760, %v263_v15 }
  0x7d   : > { %1010 = vmatpush.msrb.mxu1 %v1650_v49  ;;  %961 = vmatpush.msrb.mxu0 %v1573_v25 }
  0x7e   : > { %1099 = vmatpush.msrb.mxu2 %v1555_v19  ;;  %1147 = vmatpush.msrb.mxu3 %v1515_v5  ;;  %v2134_v19 = vld [vmem:[#allocation13_spill] sm:$0xff] }
  0x7f   : > { %1016 = vmatpush.msrb.mxu1 %v1673_v55  ;;  %963 = vmatpush.msrb.mxu0 %v1582_v28 }
  0x80   : > { %905 = vmatmul.f32.vlgmr.msra.gmra.mxu2 %v1932_v33  ;;  %1149 = vmatpush.msrb.mxu3 %v1526_v9 }
  0x81   : > { %1022 = vmatpush.msrb.mxu1 %v1693_v61  ;;  %965 = vmatpush.msrb.mxu0 %v1603_v35 }
  0x82   : > { %1102 = vmatpush.msrb.mxu2 %v1558_v20  ;;  %797 = vmatmul.f32.vlgmr.msra.gmra.mxu0 %v1945_v42  ;;  %v979_v20 = vsub.f32 %v263_v15, %v978_v16 }
  0x83   : > { %1028 = vmatpush.msrb.mxu1 %v1702_v1  ;;  %967 = vmatpush.msrb.mxu0 %v1636_v45 }
  0x84   : > { %942 = vmatmul.f32.vlgmr.msra.gmra.mxu3 %v1932_v33  ;;  %1105 = vmatpush.msrb.mxu2 %v1561_v21  ;;  %v2135_v21 = vld [vmem:[#allocation2_spill] sm:$0xff] }
  0x85   : > { %1034 = vmatpush.msrb.mxu1 %v1729_v18  ;;  %969 = vmatpush.msrb.mxu0 %v1641_v47 }
  0x86   : > { %1151 = vmatpush.msrb.mxu3 %v1528_v10  ;;  %836 = vmatmul.f32.vlgmr.msra.gmra.mxu1 %v639_v41  ;;  %v1304_v41 = vstv %s1407_s11 }
  0x87   : > { %1040 = vmatpush.msrb.mxu1 %v1748_v32  ;;  %971 = vmatpush.msrb.mxu0 %v1678_v57 }
  0x88   : > { %1108 = vmatpush.msrb.mxu2 %v1585_v29  ;;  %1153 = vmatpush.msrb.mxu3 %v1530_v11 }
  0x89   : > { %1046 = vmatpush.msrb.mxu1 %v1768_v53  ;;  %973 = vmatpush.msrb.mxu0 %v1700_v0 }
  0x8a   : > { %1111 = vmatpush.msrb.mxu2 %v1617_v40  ;;  %1155 = vmatpush.msrb.mxu3 %v1548_v17 }
  0x8b   : > { %1052 = vmatpush.msrb.mxu1 %v1782_v6  ;;  %975 = vmatpush.msrb.mxu0 %v1717_v8 }
  0x8c   : > { %1114 = vmatpush.msrb.mxu2 %v2127_v48  ;;  %1157 = vmatpush.msrb.mxu3 %v1573_v25 }
  0x8d   : > { %1058 = vmatpush.msrb.mxu1 %v1795_v50  ;;  %977 = vmatpush.msrb.mxu0 %v1733_v30 }
  0x8e   : > { %1117 = vmatpush.msrb.mxu2 %v2128_v2  ;;  %1159 = vmatpush.msrb.mxu3 %v1582_v28 }
  0x8f   : > { %1184 = vmatpush.msra.mxu0 %v1565_v22  ;;  %1064 = vmatpush.msrb.mxu1 %v1806_v59  ;;  %v980_v22 = vand.u32 4294901760, %v979_v20 }
  0x90   : > { %1120 = vmatpush.msrb.mxu2 %v2130_v46  ;;  %1161 = vmatpush.msrb.mxu3 %v1603_v35 }
  0x91   : > { %1188 = vmatpush.msra.mxu0 %v1568_v23  ;;  %1070 = vmatpush.msrb.mxu1 %v1815_v12  ;;  %v2136_v23 = vld [vmem:[#allocation3_spill] sm:$0xff] }
  0x92   : > { %1123 = vmatpush.msrb.mxu2 %v2131_v36  ;;  %1163 = vmatpush.msrb.mxu3 %v1636_v45 }
  0x93   : > { %1192 = vmatpush.msra.mxu0 %v1571_v24  ;;  %1076 = vmatpush.msrb.mxu1 %v1822_v62  ;;  %v1461_v24 = vmov 0.0  }
  0x94   : > { %1126 = vmatpush.msrb.mxu2 %v2132_v26  ;;  %1165 = vmatpush.msrb.mxu3 %v1641_v47  ;;  %242 = vst.msk [vmem:[%s2077_s10] sm:$0xff] %vm241_vm0, %v1461_v24 }
  0x95   : > { %1196 = vmatpush.msra.mxu0 %v1580_v27  ;;  %1082 = vmatpush.msrb.mxu1 %v2134_v19 }
  0x96   : > { %1129 = vmatpush.msrb.mxu2 %v1736_v31  ;;  %1167 = vmatpush.msrb.mxu3 %v1678_v57 }
  0x97   : > { %1251 = vmatpush.msra.mxu1 %v1511_v3  ;;  %1200 = vmatpush.msra.mxu0 %v2135_v21  ;;  %v981_v3 = vsub.f32 %v979_v20, %v980_v22 }
  0x98   : > { %1169 = vmatpush.msrb.mxu3 %v1700_v0  ;;  %1084 = vmatmul.f32.vlgmr.msrb.gmra.mxu1 %v978_v16 }
  0x99   : > { %1253 = vmatpush.msra.mxu1 %v1513_v4  ;;  %1204 = vmatpush.msra.mxu0 %v1601_v34  ;;  %v2137_v4 = vld [vmem:[#allocation10_spill] sm:$0xff] }
  0x9a   : > { %1132 = vmatpush.msrb.mxu2 %v2137_v4  ;;  %1171 = vmatpush.msrb.mxu3 %v1717_v8 }
  0x9b   : > { %1255 = vmatpush.msra.mxu1 %v1515_v5  ;;  %1208 = vmatpush.msra.mxu0 %v2136_v23  ;;  %v982_v5 = vand.u32 4294901760, %v981_v3  ;;  %v1316_v19 = vld [vmem:[%s2077_s10] sm:$0x1] }
  0x9c   : > { %1135 = vmatpush.msrb.mxu2 %v1774_v60  ;;  %1173 = vmatpush.msrb.mxu3 %v1733_v30 }
  0x9d   : > { %1257 = vmatpush.msra.mxu1 %v1526_v9  ;;  %1212 = vmatpush.msra.mxu0 %v1655_v51  ;;  %v2138_v9 = vld [vmem:[#allocation9_spill] sm:$0xff] }
  0x9e   : > { %1138 = vmatmul.f32.vlgmr.msrb.gmra.mxu2 %v979_v20  ;;  %983 = vmatmul.f32.vlgmr.msrb.gmra.mxu0 %v982_v5 }
  0x9f   : > { %1259 = vmatpush.msra.mxu1 %v1528_v10  ;;  %1216 = vmatpush.msra.mxu0 %v1676_v56 }
  0xa0   : > { %1177 = vmatmul.f32.vlgmr.msrb.gmra.mxu3 %v980_v22 }
  0xa1   : > { %1261 = vmatpush.msra.mxu1 %v1530_v11  ;;  %1220 = vmatpush.msra.mxu0 %v1698_v63 }
  0xa3   : > { %1263 = vmatpush.msra.mxu1 %v1548_v17  ;;  %1224 = vmatpush.msra.mxu0 %v1715_v7 }
  0xa5   : > { %1265 = vmatpush.msra.mxu1 %v1573_v25  ;;  %1228 = vmatpush.msra.mxu0 %v1723_v13  ;;  %v1302_v13 = vlaneseq }
  0xa7   : > { %1267 = vmatpush.msra.mxu1 %v1582_v28  ;;  %1232 = vmatpush.msra.mxu0 %v2138_v9  ;;  %v1303_v39 = vshrl.u32 %v1302_v13, 7 }
  0xa9   : > { %1269 = vmatpush.msra.mxu1 %v1603_v35  ;;  %1236 = vmatpush.msra.mxu0 %v1771_v54  ;;  %v1305_v60 = vadd.s32 %v1304_v41, %v1303_v39 }
  0xab   : > { %1271 = vmatpush.msra.mxu1 %v1636_v45  ;;  %1240 = vmatpush.msra.mxu0 %v1787_v52  ;;  %vm1306_vm4 = vcmp.lt.s32.totalorder %v1305_v60, 2 }
  0xad   : > { %1273 = vmatpush.msra.mxu1 %v1641_v47  ;;  %1244 = vmatpush.msra.mxu0 %v1800_v58 }
  0xae   : > { %1246 = vmatmul.f32.vlgmr.msra.gmra.mxu0 %v978_v16 }
  0xaf   : > { %1275 = vmatpush.msra.mxu1 %v1678_v57 }
  0xb1   : > { %1277 = vmatpush.msra.mxu1 %v1700_v0 }
  0xb3   : > { %1279 = vmatpush.msra.mxu1 %v1717_v8 }
  0xb5   : > { %1281 = vmatpush.msra.mxu1 %v1733_v30  ;;  %v302_v10 = vpop.f32.mrf.mxu0 }
  0xb6   : > { %1283 = vmatmul.f32.vlgmr.msra.gmra.mxu1 %v978_v16 }
  0xbb   : > { %v403_v11 = vpop.f32.mrf.mxu1 }
  0xbc   : > { %v404_v8 = vadd.f32 %v403_v11, %v302_v10 }
  0xbd   : > { %v457_v17 = vpop.f32.mrf.mxu2  ;;  %v496_v25 = vpop.f32.mrf.mxu3 }
  0xbe   : > { %v458_v12 = vadd.f32 %v457_v17, %v404_v8 }
  0xc0   : > { %v497_v31 = vadd.f32 %v496_v25, %v458_v12 }
  0xcb   : > { %v565_v27 = vpop.f32.mrf.mxu0 }
  0xcc   : > { %v566_v53 = vadd.f32 %v565_v27, %v497_v31 }
  0xd3   : > { %v602_v28 = vpop.f32.mrf.mxu1 }
  0xd4   : > { %v603_v62 = vadd.f32 %v602_v28, %v566_v53 }
  0xf9   : > { %v643_v29 = vpop.f32.mrf.mxu2 }
  0xfb   : > { %v744_v33 = vpop.f32.mrf.mxu3 }
  0xfc   : > { %v745_v40 = vadd.f32 %v744_v33, %v643_v29 }
  0xff   : > { %v798_v34 = vpop.f32.mrf.mxu0 }
 0x100   : > { %v799_v49 = vadd.f32 %v798_v34, %v745_v40 }
 0x103   : > { %v837_v35 = vpop.f32.mrf.mxu1  ;;  %v906_v37 = vpop.f32.mrf.mxu2 }
 0x104   : > { %v838_v55 = vadd.f32 %v837_v35, %v799_v49 }
 0x106   : > { %v907_v58 = vadd.f32 %v906_v37, %v838_v55 }
 0x107   : > { %v943_v38 = vpop.f32.mrf.mxu3 }
 0x108   : > { %v944_v63 = vadd.f32 %v943_v38, %v907_v58 }
 0x115   : > { %v1085_v43 = vpop.f32.mrf.mxu1 }
 0x11b   : > { %v984_v42 = vpop.f32.mrf.mxu0 }
 0x11c   : > { %v1086_v45 = vadd.f32 %v1085_v43, %v984_v42 }
 0x121   : > { %v1139_v47 = vpop.f32.mrf.mxu2 }
 0x122   : > { %v1140_v51 = vadd.f32 %v1139_v47, %v1086_v45 }
 0x123   : > { %v1178_v52 = vpop.f32.mrf.mxu3 }
 0x124   : > { %v1179_v56 = vadd.f32 %v1178_v52, %v1140_v51 }
 0x12b   : > { %v1247_v57 = vpop.f32.mrf.mxu0 }
 0x12c   : > { %v1248_v59 = vadd.f32 %v1247_v57, %v1179_v56 }
 0x133   : > { %v1284_v61 = vpop.f32.mrf.mxu1 }
 0x134   : > { %v1285_v0 = vadd.f32 %v1284_v61, %v1248_v59 }
 0x136   : > { %v1287_v1 = vmul.f32 %v1285_v0, %v944_v63 }
 0x138   : > { %v1288_v7 = vmax.f32 %v1287_v1, 1e-16 }
 0x13a   : > { %1435 = vrsqrt.f32 %v1288_v7  ;;  %vm1295_vm2 = vweird.f32 %v1288_v7 }
 0x140   : > { %v1436_v18 = vpop.eup %1435 }
 0x141   : > { %v1290_v30 = vmul.f32 %v1436_v18, %v1288_v7  ;;  %vm1296_vm1 = vweird.f32 %v1436_v18 }
 0x142   : > { %vm1297_vm3 = vmor %vm1295_vm2, %vm1296_vm1 }
 0x143   : > { %v1291_v32 = vmul.f32 %v1436_v18, %v1290_v30 }
 0x145   : > { %v1292_v50 = vmul.f32 0.5, %v1291_v32 }
 0x147   : > { %v1293_v54 = vsub.f32 1.5, %v1292_v50 }
 0x149   : > { %v1294_v6 = vmul.f32 %v1436_v18, %v1293_v54 }
 0x14b   : > { %v1298_v36 = vsel %vm1297_vm3, %v1436_v18, %v1294_v6 }
 0x14c   : > { %v1299_v48 = vmul.f32 %v1298_v36, %v603_v62 }
 0x14e   : > { %v1307_v2 = vsel %vm1306_vm4, %v1299_v48, 0.0 }
 0x14f   : > { %v1309_v46 = vsel %vm241_vm0, %v1307_v2, 0.0 }
 0x150   : > { %v1310_v26 = vrot.slane %v1309_v46, 4 }
 0x152   : > { %v1311_v44 = vadd.f32 %v1310_v26, %v1309_v46 }
 0x154   : > { %v1312_v14 = vrot.slane %v1311_v44, 2 }
 0x156   : > { %v1313_v15 = vadd.f32 %v1312_v14, %v1311_v44 }
 0x158   : > { %v1314_v16 = vrot.slane %v1313_v15, 1 }
 0x15a   : > { %v1315_v20 = vadd.f32 %v1314_v16, %v1313_v15 }
 0x15c   : > { %v1317_v21 = vadd.f32 %v1316_v19, %v1315_v20 }
 0x15e   : > { %1319 = vst.msk [vmem:[%s2077_s10] sm:$0x1] %vm1318_vm5, %v1317_v21 }
 0x15f PF: > { %s13_s14 = sadd.s32 1, %s1459_s14   ;;  %s2139_s12 = smov %s1455_s13 }
 0x160   : > { %p10_p6 = scmp.ge.s32.totalorder %s13_s14, 4   ;;  %s2140_s13 = smov %s2142_s15 }
 0x162   :  { %12 = sbr.rel (!%p10_p6) target bundleno = 2 (0x2), region = 69 }

</bundles_post_ra>
